<compile_context>
chip_gen: v7x
topology: tpu7x:2x2x1
jax: 0.10.0
libtpu: 0.0.40
codegen_flags: <defaults>
</compile_context>

<pallas_src>
import functools

import jax
import jax.numpy as jnp
from jax.experimental import pallas as pl
from jax.experimental.pallas import tpu as pltpu

EPS = 1e-5
LANES = 128           # TPU vreg lane width
NEG_INF = -1e30       # pad value for padded logit columns


# --------------------------- Pallas kernel (hot path) ---------------------------

def mlp_kernel(x_ref,                      # (TB, D_in)   batch block of features
               w1_ref, w2_ref, w3_ref,     # BN-folded weights (D_in,H),(H,H),(H,E)
               wout_ref,                   # (E, P_pad)   padded product embeddings^T
               bpack_ref,                  # (6, 128)     [b1', b2', b3', a1, a2, a3]
               bout_ref,                   # (1, P_pad)   output bias (-1e30 padded)
               tgt_ref,                    # (TB, 1)      int32 targets
               logits_ref,                 # (TB, P_pad)  output logits (lane-dense)
               nll_ref,                    # (TB, 128)    per-row masked NLL
               *, hidden_dim, embed_dim, ignore_index):
    H, E = hidden_dim, embed_dim
    bp = bpack_ref[...]                    # tiny (6,128) load, reused below

    def prelu(v, a_row):                   # PReLU with pre-broadcast alpha row
        return jnp.where(v > 0, v, a_row * v)

    x = x_ref[...]
    h = jnp.dot(x, w1_ref[...], preferred_element_type=jnp.float32) + bp[0:1, :H]
    h = prelu(h, bp[3:4, :H])
    # dropout_1: identity (eval mode)
    h = jnp.dot(h, w2_ref[...], preferred_element_type=jnp.float32) + bp[1:2, :H]
    h = prelu(h, bp[4:5, :H])
    # dropout_2: identity (eval mode)
    h = jnp.dot(h, w3_ref[...], preferred_element_type=jnp.float32) + bp[2:3, :E]
    h = prelu(h, bp[5:6, :E])
    # dropout_3: identity (eval mode)

    logits = jnp.dot(h, wout_ref[...], preferred_element_type=jnp.float32) + bout_ref[...]
    logits_ref[...] = logits               # unmasked lane-dense store

    # per-row cross-entropy term; rows with target == ignore_index masked to 0
    TB, Pp = logits.shape
    m = jnp.max(logits, axis=-1, keepdims=True)
    lse = m + jnp.log(jnp.sum(jnp.exp(logits - m), axis=-1, keepdims=True))     # (TB, 1)
    tgt = tgt_ref[...]                                                          # (TB, 1)
    col = jax.lax.broadcasted_iota(jnp.int32, (TB, Pp), 1)
    tgt_logit = jnp.sum(jnp.where(col == tgt, logits, 0.0), axis=-1, keepdims=True)
    valid = tgt != ignore_index
    per_row = jnp.where(valid, lse - tgt_logit, 0.0)                            # (TB, 1)
    nll_ref[...] = jnp.broadcast_to(per_row, nll_ref.shape)


# ------------------------------- wrapper -------------------------------

def _fold_bn(w, b, bn):
    """Fold eval-mode BatchNorm1d into the preceding Linear.
    w: (out, in) torch layout, b: (out,), bn: (4, out) = [gamma, beta, mean, var].
    Returns (w_folded^T : (in, out), b_folded : (out,))."""
    gamma, beta, mean, var = bn[0], bn[1], bn[2], bn[3]
    scale = gamma * jax.lax.rsqrt(var + EPS)
    w_f = (w * scale[:, None]).T           # scale per output column
    b_f = (b - mean) * scale + beta
    return w_f, b_f


def mlp_pallas(alphas, x_cat, w1, b1, bn1, w2, b2, bn2, w3, b3, bn3,
               emb_products, out_bias, target, *, ignore_index, block_b=8):
    B, D_in = x_cat.shape
    H = w1.shape[0]
    E = w3.shape[0]
    P = emb_products.shape[0]
    assert H <= LANES and E <= LANES, "bias/alpha packing assumes H, E <= 128"
    assert block_b % 8 == 0, "batch block must be a multiple of 8 sublanes"

    # ---- wrapper-side BN folding + operand packing (free at trace time) ----
    w1f, b1f = _fold_bn(w1, b1, bn1)
    w2f, b2f = _fold_bn(w2, b2, bn2)
    w3f, b3f = _fold_bn(w3, b3, bn3)

    bpack = jnp.zeros((6, LANES), jnp.float32)
    bpack = bpack.at[0, :H].set(b1f).at[1, :H].set(b2f).at[2, :E].set(b3f)
    bpack = (bpack.at[3, :H].set(alphas[0])
                  .at[4, :H].set(alphas[1])
                  .at[5, :E].set(alphas[2]))

    # ---- lane-dense logits: pad product axis to a multiple of 128 ----
    P_pad = ((P + LANES - 1) // LANES) * LANES
    w_out = jnp.zeros((E, P_pad), jnp.float32).at[:, :P].set(emb_products.T)
    b_out = jnp.full((1, P_pad), NEG_INF, jnp.float32).at[0, :P].set(out_bias)

    # ---- batch padding so the grid divides evenly (padded rows -> ignore) ----
    TB = block_b
    B_pad = ((B + TB - 1) // TB) * TB
    x_p = jnp.zeros((B_pad, D_in), jnp.float32).at[:B].set(x_cat)
    tgt_p = jnp.full((B_pad, 1), ignore_index, jnp.int32).at[:B].set(
        target.astype(jnp.int32))
    nb = B_pad // TB

    kernel = functools.partial(mlp_kernel, hidden_dim=H, embed_dim=E,
                               ignore_index=ignore_index)
    logits_p, nll = pl.pallas_call(
        kernel,
        grid=(nb,),
        in_specs=[
            pl.BlockSpec((TB, D_in), lambda i: (i, 0)),     # x       (batch-blocked)
            pl.BlockSpec((D_in, H), lambda i: (0, 0)),      # w1'     (resident)
            pl.BlockSpec((H, H), lambda i: (0, 0)),         # w2'     (resident)
            pl.BlockSpec((H, E), lambda i: (0, 0)),         # w3'     (resident)
            pl.BlockSpec((E, P_pad), lambda i: (0, 0)),     # w_out   (resident, padded)
            pl.BlockSpec((6, LANES), lambda i: (0, 0)),     # biases + alphas pack
            pl.BlockSpec((1, P_pad), lambda i: (0, 0)),     # b_out   (padded, -1e30)
            pl.BlockSpec((TB, 1), lambda i: (i, 0)),        # targets (batch-blocked)
        ],
        out_specs=(
            pl.BlockSpec((TB, P_pad), lambda i: (i, 0)),    # logits  (lane-dense)
            pl.BlockSpec((TB, LANES), lambda i: (i, 0)),    # per-row masked NLL
        ),
        out_shape=(jax.ShapeDtypeStruct((B_pad, P_pad), jnp.float32),
                   jax.ShapeDtypeStruct((B_pad, LANES), jnp.float32)),
        compiler_params=pltpu.CompilerParams(
            dimension_semantics=("parallel",)),
    )(x_p, w1f, w2f, w3f, w_out, bpack, b_out, tgt_p)

    logits = logits_p[:B, :P]
    # Accumulate total and count separately, divide once (CE mean with ignore_index).
    count = jnp.sum((target[:, 0] != ignore_index).astype(jnp.float32))
    loss = jnp.sum(nll[:, 0]) / count        # padded / ignored rows contribute 0
    return logits, loss


# ------------------------- plain-JAX glue (feature tower) -------------------------

def make_bn_params(key, dim):
    k1, k2, k3, k4 = jax.random.split(key, 4)
    gamma = 1.0 + 0.1 * jax.random.normal(k1, (dim,), jnp.float32)
    beta = 0.1 * jax.random.normal(k2, (dim,), jnp.float32)
    mean = 0.1 * jax.random.normal(k3, (dim,), jnp.float32)
    var = 1.0 + jnp.abs(0.1 * jax.random.normal(k4, (dim,), jnp.float32))
    return jnp.stack([gamma, beta, mean, var], axis=0)          # (4, dim)


def bn_eval_jax(x, bn):
    return (x - bn[2]) * jax.lax.rsqrt(bn[3] + EPS) * bn[0] + bn[1]


def feature_tower(params, inputs, dict_embed, list_linear):
    """Builds x_cat = [lag_embed, category_embed, url_embed, x] in plain JAX."""
    B = inputs['lag_products'].shape[0]

    def get_embed(idx, table):
        return jnp.take(table, idx, axis=0).reshape(B, -1)

    lag_embed = get_embed(inputs['lag_products'], params['embedding_products'])
    first_product = get_embed(inputs['first_product'], params['embedding_products'])
    category_embed = get_embed(inputs['lag_categories'], params['embedding_categories'])
    first_category = get_embed(inputs['first_category'], params['embedding_categories'])
    url_embed = get_embed(inputs['lag_urls'], params['embedding_urls'])
    first_url = get_embed(inputs['first_url'], params['embedding_urls'])

    x = first_product + first_category + first_url
    for k in dict_embed:
        x = x + get_embed(inputs[k], params['embedding_' + k])
    for k in list_linear + ['lag_descriptions', 'lag_imgs']:
        y = inputs[k] @ params['linear_' + k].T            # (B, E), no bias
        y = jax.nn.relu(bn_eval_jax(y, params['norm_' + k]))
        x = x + y
    return jnp.concatenate([lag_embed, category_embed, url_embed, x], axis=-1)


if __name__ == "__main__":
    # ---- configuration (small, consistent with the module's __init__) ----
    B = 12            # not a multiple of the batch block -> exercises batch padding
    E = 16            # embedding_dim
    H = 32            # hidden_dim
    NUM_PRODUCTS, NUM_CATEGORIES, NUM_URLS = 64, 32, 48
    LAG_T, LAG_C, LAG_U = 3, 3, 3                  # len(lag_targets/categories/urls)
    D_IN = (LAG_T + LAG_C + LAG_U + 1) * E         # linear_1 input features
    IGNORE_INDEX = 0                               # low_targets

    dict_embed = {'dayofweek': 7, 'hour': 24, 'weekend': 2, 'product_action_id': 4,
                  'price_null': 2, 'description_null': 2, 'img_null': 2}
    list_linear = ['last_event_length', 'cum_product', 'cum_search', 'cum_pageview',
                   'cum_event', 'num_search', 'num_pageview', 'num_following_search',
                   'num_following_pageview', 'cum_search_last', 'cum_pageview_last',
                   'lapse', 'product_count', 'category_hash_count',
                   'hashed_url_count', 'price_bucket']

    root = jax.random.PRNGKey(0)
    keys = iter(jax.random.split(root, 256))

    # ---- deterministic parameters ----
    params = {}
    params['embedding_products'] = 0.01 * jax.random.normal(next(keys), (NUM_PRODUCTS, E), jnp.float32)
    params['embedding_categories'] = 0.01 * jax.random.normal(next(keys), (NUM_CATEGORIES, E), jnp.float32)
    params['embedding_urls'] = 0.01 * jax.random.normal(next(keys), (NUM_URLS, E), jnp.float32)
    for k, v in dict_embed.items():
        params['embedding_' + k] = 0.01 * jax.random.normal(next(keys), (v, E), jnp.float32)
    for k in list_linear:
        params['linear_' + k] = 0.3 * jax.random.normal(next(keys), (E, 1), jnp.float32)
        params['norm_' + k] = make_bn_params(next(keys), E)
    for k in ['lag_descriptions', 'lag_imgs']:
        params['linear_' + k] = 0.3 * jax.random.normal(next(keys), (E, 8), jnp.float32)
        params['norm_' + k] = make_bn_params(next(keys), E)

    w1 = 0.05 * jax.random.normal(next(keys), (H, D_IN), jnp.float32)
    b1 = 0.05 * jax.random.normal(next(keys), (H,), jnp.float32)
    bn1 = make_bn_params(next(keys), H)
    w2 = 0.05 * jax.random.normal(next(keys), (H, H), jnp.float32)
    b2 = 0.05 * jax.random.normal(next(keys), (H,), jnp.float32)
    bn2 = make_bn_params(next(keys), H)
    w3 = 0.05 * jax.random.normal(next(keys), (E, H), jnp.float32)
    b3 = 0.05 * jax.random.normal(next(keys), (E,), jnp.float32)
    bn3 = make_bn_params(next(keys), E)
    out_bias = 0.01 * jax.random.normal(next(keys), (NUM_PRODUCTS,), jnp.float32)
    alphas = jnp.array([0.25, 0.25, 0.25], dtype=jnp.float32)   # PReLU init

    # ---- deterministic example inputs (the input_dict) ----
    inputs = {
        'lag_products': jax.random.randint(next(keys), (B, LAG_T), 0, NUM_PRODUCTS),
        'first_product': jax.random.randint(next(keys), (B, 1), 0, NUM_PRODUCTS),
        'lag_categories': jax.random.randint(next(keys), (B, LAG_C), 0, NUM_CATEGORIES),
        'first_category': jax.random.randint(next(keys), (B, 1), 0, NUM_CATEGORIES),
        'lag_urls': jax.random.randint(next(keys), (B, LAG_U), 0, NUM_URLS),
        'first_url': jax.random.randint(next(keys), (B, 1), 0, NUM_URLS),
        'lag_descriptions': jax.random.normal(next(keys), (B, 8), jnp.float32),
        'lag_imgs': jax.random.normal(next(keys), (B, 8), jnp.float32),
        'target': jax.random.randint(next(keys), (B, 1), 0, NUM_PRODUCTS),
    }
    for k, v in dict_embed.items():
        inputs[k] = jax.random.randint(next(keys), (B, 1), 0, v)
    for k in list_linear:
        inputs[k] = jax.random.normal(next(keys), (B, 1), jnp.float32)
    # exercise ignore_index masking and guarantee at least one valid target
    inputs['target'] = inputs['target'].at[0, 0].set(IGNORE_INDEX).at[1, 0].set(5)

    # ---- glue: build concatenated feature vector in plain JAX ----
    x_cat = feature_tower(params, inputs, dict_embed, list_linear)   # (B, D_IN)
    assert x_cat.shape == (B, D_IN)

    # ---- Pallas kernel: batch-gridded 3-layer MLP + logits + per-row CE ----
    logits, loss = mlp_pallas(
        alphas, x_cat,
        w1, b1, bn1, w2, b2, bn2, w3, b3, bn3,
        params['embedding_products'], out_bias,
        inputs['target'], ignore_index=IGNORE_INDEX, block_b=8)
    jax.block_until_ready((logits, loss))

    # ---- pure-JAX reference (original, unfolded BN semantics) ----
    def prelu(x, a):
        return jnp.where(x > 0, x, a * x)
    h = prelu(bn_eval_jax(x_cat @ w1.T + b1, bn1), alphas[0])
    h = prelu(bn_eval_jax(h @ w2.T + b2, bn2), alphas[1])
    h = prelu(bn_eval_jax(h @ w3.T + b3, bn3), alphas[2])
    ref_logits = h @ params['embedding_products'].T + out_bias
    tgt = inputs['target'][:, 0]
    logp = jax.nn.log_softmax(ref_logits, axis=-1)
    nll_ref = -jnp.take_along_axis(logp, tgt[:, None], axis=-1)[:, 0]
    mask = (tgt != IGNORE_INDEX).astype(jnp.float32)
    ref_loss = jnp.sum(nll_ref * mask) / jnp.sum(mask)

    assert logits.shape == (B, NUM_PRODUCTS)
    assert jnp.allclose(logits, ref_logits, atol=1e-3, rtol=1e-3), "logits mismatch"
    assert jnp.allclose(loss, ref_loss, atol=1e-3, rtol=1e-3), "loss mismatch"

    print("KERNEL_OK")
</pallas_src>

<mosaic_0001>
module attributes {stable_mosaic.version = 11 : i64} {
  func.func @mlp_kernel(%arg0: i32, %arg1: memref<8x160xf32, #tpu.memory_space<vmem>>, %arg2: memref<160x32xf32, #tpu.memory_space<vmem>>, %arg3: memref<32x32xf32, #tpu.memory_space<vmem>>, %arg4: memref<32x16xf32, #tpu.memory_space<vmem>>, %arg5: memref<16x128xf32, #tpu.memory_space<vmem>>, %arg6: memref<6x128xf32, #tpu.memory_space<vmem>>, %arg7: memref<1x128xf32, #tpu.memory_space<vmem>>, %arg8: memref<8x1xi32, #tpu.memory_space<vmem>>, %arg9: memref<8x128xf32, #tpu.memory_space<vmem>>, %arg10: memref<8x128xf32, #tpu.memory_space<vmem>>) attributes {dimension_semantics = [#tpu.dimension_semantics<parallel>], iteration_bounds = array<i64: 2>, scalar_prefetch = 0 : i64, scratch_operands = 0 : i64, tpu.core_type = #tpu.core_type<tc>, window_params = [{transform_indices = @transform_0, window_bounds = array<i64: 8, 160>}, {pipeline_mode = #tpu.pipeline_mode<synchronous>, transform_indices = @transform_1, window_bounds = array<i64: 160, 32>}, {pipeline_mode = #tpu.pipeline_mode<synchronous>, transform_indices = @transform_2, window_bounds = array<i64: 32, 32>}, {pipeline_mode = #tpu.pipeline_mode<synchronous>, transform_indices = @transform_3, window_bounds = array<i64: 32, 16>}, {pipeline_mode = #tpu.pipeline_mode<synchronous>, transform_indices = @transform_4, window_bounds = array<i64: 16, 128>}, {pipeline_mode = #tpu.pipeline_mode<synchronous>, transform_indices = @transform_5, window_bounds = array<i64: 6, 128>}, {pipeline_mode = #tpu.pipeline_mode<synchronous>, transform_indices = @transform_6, window_bounds = array<i64: 1, 128>}, {transform_indices = @transform_7, window_bounds = array<i64: 8, 1>}, {transform_indices = @transform_8, window_bounds = array<i64: 8, 128>}, {transform_indices = @transform_9, window_bounds = array<i64: 8, 128>}]} {
    %c0 = arith.constant 0 : index
    %c0_0 = arith.constant 0 : index
    %0 = vector.load %arg6[%c0, %c0_0] : memref<6x128xf32, #tpu.memory_space<vmem>>, vector<6x128xf32>
    %c0_1 = arith.constant 0 : index
    %c0_2 = arith.constant 0 : index
    %1 = vector.load %arg1[%c0_1, %c0_2] : memref<8x160xf32, #tpu.memory_space<vmem>>, vector<8x160xf32>
    %c0_3 = arith.constant 0 : index
    %c0_4 = arith.constant 0 : index
    %2 = vector.load %arg2[%c0_3, %c0_4] : memref<160x32xf32, #tpu.memory_space<vmem>>, vector<160x32xf32>
    %cst = arith.constant dense<0.000000e+00> : vector<8x32xf32>
    %3 = tpu.matmul %1, %2, %cst {dimension_numbers = #tpu.dot_dimension_numbers<[1], [0], [0], [1], [0, 0, 1, 1], [], []>} : vector<8x160xf32>, vector<160x32xf32>, vector<8x32xf32> -> vector<8x32xf32>
    %4 = vector.extract_strided_slice %0 {offsets = [0, 0], sizes = [1, 32], strides = [1, 1]} : vector<6x128xf32> to vector<1x32xf32>
    %5 = vector.broadcast %4 : vector<1x32xf32> to vector<8x32xf32>
    %6 = arith.addf %3, %5 : vector<8x32xf32>
    %7 = vector.extract_strided_slice %0 {offsets = [3, 0], sizes = [1, 32], strides = [1, 1]} : vector<6x128xf32> to vector<1x32xf32>
    %cst_5 = arith.constant 0.000000e+00 : f32
    %8 = vector.broadcast %cst_5 : f32 to vector<8x32xf32>
    %9 = arith.cmpf ogt, %6, %8 : vector<8x32xf32>
    %10 = vector.broadcast %7 : vector<1x32xf32> to vector<8x32xf32>
    %11 = arith.mulf %10, %6 : vector<8x32xf32>
    %12 = arith.select %9, %6, %11 : vector<8x32xi1>, vector<8x32xf32>
    %c0_6 = arith.constant 0 : index
    %c0_7 = arith.constant 0 : index
    %13 = vector.load %arg3[%c0_6, %c0_7] : memref<32x32xf32, #tpu.memory_space<vmem>>, vector<32x32xf32>
    %cst_8 = arith.constant dense<0.000000e+00> : vector<8x32xf32>
    %14 = tpu.matmul %12, %13, %cst_8 {dimension_numbers = #tpu.dot_dimension_numbers<[1], [0], [0], [1], [0, 0, 1, 1], [], []>} : vector<8x32xf32>, vector<32x32xf32>, vector<8x32xf32> -> vector<8x32xf32>
    %15 = vector.extract_strided_slice %0 {offsets = [1, 0], sizes = [1, 32], strides = [1, 1]} : vector<6x128xf32> to vector<1x32xf32>
    %16 = vector.broadcast %15 : vector<1x32xf32> to vector<8x32xf32>
    %17 = arith.addf %14, %16 : vector<8x32xf32>
    %18 = vector.extract_strided_slice %0 {offsets = [4, 0], sizes = [1, 32], strides = [1, 1]} : vector<6x128xf32> to vector<1x32xf32>
    %cst_9 = arith.constant 0.000000e+00 : f32
    %19 = vector.broadcast %cst_9 : f32 to vector<8x32xf32>
    %20 = arith.cmpf ogt, %17, %19 : vector<8x32xf32>
    %21 = vector.broadcast %18 : vector<1x32xf32> to vector<8x32xf32>
    %22 = arith.mulf %21, %17 : vector<8x32xf32>
    %23 = arith.select %20, %17, %22 : vector<8x32xi1>, vector<8x32xf32>
    %c0_10 = arith.constant 0 : index
    %c0_11 = arith.constant 0 : index
    %24 = vector.load %arg4[%c0_10, %c0_11] : memref<32x16xf32, #tpu.memory_space<vmem>>, vector<32x16xf32>
    %cst_12 = arith.constant dense<0.000000e+00> : vector<8x16xf32>
    %25 = tpu.matmul %23, %24, %cst_12 {dimension_numbers = #tpu.dot_dimension_numbers<[1], [0], [0], [1], [0, 0, 1, 1], [], []>} : vector<8x32xf32>, vector<32x16xf32>, vector<8x16xf32> -> vector<8x16xf32>
    %26 = vector.extract_strided_slice %0 {offsets = [2, 0], sizes = [1, 16], strides = [1, 1]} : vector<6x128xf32> to vector<1x16xf32>
    %27 = vector.broadcast %26 : vector<1x16xf32> to vector<8x16xf32>
    %28 = arith.addf %25, %27 : vector<8x16xf32>
    %29 = vector.extract_strided_slice %0 {offsets = [5, 0], sizes = [1, 16], strides = [1, 1]} : vector<6x128xf32> to vector<1x16xf32>
    %cst_13 = arith.constant 0.000000e+00 : f32
    %30 = vector.broadcast %cst_13 : f32 to vector<8x16xf32>
    %31 = arith.cmpf ogt, %28, %30 : vector<8x16xf32>
    %32 = vector.broadcast %29 : vector<1x16xf32> to vector<8x16xf32>
    %33 = arith.mulf %32, %28 : vector<8x16xf32>
    %34 = arith.select %31, %28, %33 : vector<8x16xi1>, vector<8x16xf32>
    %c0_14 = arith.constant 0 : index
    %c0_15 = arith.constant 0 : index
    %35 = vector.load %arg5[%c0_14, %c0_15] : memref<16x128xf32, #tpu.memory_space<vmem>>, vector<16x128xf32>
    %cst_16 = arith.constant dense<0.000000e+00> : vector<8x128xf32>
    %36 = tpu.matmul %34, %35, %cst_16 {dimension_numbers = #tpu.dot_dimension_numbers<[1], [0], [0], [1], [0, 0, 1, 1], [], []>} : vector<8x16xf32>, vector<16x128xf32>, vector<8x128xf32> -> vector<8x128xf32>
    %c0_17 = arith.constant 0 : index
    %c0_18 = arith.constant 0 : index
    %37 = vector.load %arg7[%c0_17, %c0_18] : memref<1x128xf32, #tpu.memory_space<vmem>>, vector<1x128xf32>
    %38 = vector.broadcast %37 : vector<1x128xf32> to vector<8x128xf32>
    %39 = arith.addf %36, %38 : vector<8x128xf32>
    %c0_19 = arith.constant 0 : index
    %c0_20 = arith.constant 0 : index
    %40 = vector.load %arg9[%c0_19, %c0_20] : memref<8x128xf32, #tpu.memory_space<vmem>>, vector<8x128xf32>
    tpu.vector_store %arg9[%c0_19, %c0_20], %39 {strides = array<i32>} : memref<8x128xf32, #tpu.memory_space<vmem>>, vector<8x128xf32>,
    %cst_21 = arith.constant dense<0xFF800000> : vector<8xf32>
    %41 = vector.multi_reduction <maximumf>, %39, %cst_21 [1] : vector<8x128xf32> to vector<8xf32>
    %42 = vector.shape_cast %41 : vector<8xf32> to vector<8x1xf32>
    %43 = vector.broadcast %42 : vector<8x1xf32> to vector<8x128xf32>
    %44 = arith.subf %39, %43 : vector<8x128xf32>
    %45 = math.exp %44 : vector<8x128xf32>
    %cst_22 = arith.constant dense<0.000000e+00> : vector<8xf32>
    %46 = vector.multi_reduction <add>, %45, %cst_22 [1] : vector<8x128xf32> to vector<8xf32>
    %47 = vector.shape_cast %46 : vector<8xf32> to vector<8x1xf32>
    %48 = math.log %47 : vector<8x1xf32>
    %49 = arith.addf %42, %48 : vector<8x1xf32>
    %c0_23 = arith.constant 0 : index
    %c0_24 = arith.constant 0 : index
    %50 = vector.load %arg8[%c0_23, %c0_24] : memref<8x1xi32, #tpu.memory_space<vmem>>, vector<8x1xi32>
    %51 = tpu.iota {dimensions = array<i32: 1>} : vector<8x128xi32>
    %52 = vector.broadcast %50 : vector<8x1xi32> to vector<8x128xi32>
    %53 = arith.cmpi eq, %51, %52 : vector<8x128xi32>
    %cst_25 = arith.constant 0.000000e+00 : f32
    %54 = vector.broadcast %cst_25 : f32 to vector<8x128xf32>
    %55 = arith.select %53, %39, %54 : vector<8x128xi1>, vector<8x128xf32>
    %cst_26 = arith.constant dense<0.000000e+00> : vector<8xf32>
    %56 = vector.multi_reduction <add>, %55, %cst_26 [1] : vector<8x128xf32> to vector<8xf32>
    %57 = vector.shape_cast %56 : vector<8xf32> to vector<8x1xf32>
    %c0_i32 = arith.constant 0 : i32
    %58 = vector.broadcast %c0_i32 : i32 to vector<8x1xi32>
    %59 = arith.cmpi ne, %50, %58 : vector<8x1xi32>
    %60 = arith.subf %49, %57 : vector<8x1xf32>
    %cst_27 = arith.constant 0.000000e+00 : f32
    %61 = vector.broadcast %cst_27 : f32 to vector<8x1xf32>
    %62 = arith.select %59, %60, %61 : vector<8x1xi1>, vector<8x1xf32>
    %63 = vector.shape_cast %62 : vector<8x1xf32> to vector<8x1xf32>
    %64 = vector.broadcast %63 : vector<8x1xf32> to vector<8x128xf32>
    %c0_28 = arith.constant 0 : index
    %c0_29 = arith.constant 0 : index
    %65 = vector.load %arg10[%c0_28, %c0_29] : memref<8x128xf32, #tpu.memory_space<vmem>>, vector<8x128xf32>
    tpu.vector_store %arg10[%c0_28, %c0_29], %64 {strides = array<i32>} : memref<8x128xf32, #tpu.memory_space<vmem>>, vector<8x128xf32>,
    return
  }
  func.func @transform_0(%arg0: i32) -> (i32, i32) {
    %c0_i32 = arith.constant 0 : i32
    %c0_i32_0 = arith.constant 0 : i32
    return %arg0, %c0_i32 : i32, i32
  }
  func.func @transform_1(%arg0: i32) -> (i32, i32) {
    %c0_i32 = arith.constant 0 : i32
    %c0_i32_0 = arith.constant 0 : i32
    %c0_i32_1 = arith.constant 0 : i32
    return %c0_i32, %c0_i32_0 : i32, i32
  }
  func.func @transform_2(%arg0: i32) -> (i32, i32) {
    %c0_i32 = arith.constant 0 : i32
    %c0_i32_0 = arith.constant 0 : i32
    %c0_i32_1 = arith.constant 0 : i32
    return %c0_i32, %c0_i32_0 : i32, i32
  }
  func.func @transform_3(%arg0: i32) -> (i32, i32) {
    %c0_i32 = arith.constant 0 : i32
    %c0_i32_0 = arith.constant 0 : i32
    %c0_i32_1 = arith.constant 0 : i32
    return %c0_i32, %c0_i32_0 : i32, i32
  }
  func.func @transform_4(%arg0: i32) -> (i32, i32) {
    %c0_i32 = arith.constant 0 : i32
    %c0_i32_0 = arith.constant 0 : i32
    %c0_i32_1 = arith.constant 0 : i32
    return %c0_i32, %c0_i32_0 : i32, i32
  }
  func.func @transform_5(%arg0: i32) -> (i32, i32) {
    %c0_i32 = arith.constant 0 : i32
    %c0_i32_0 = arith.constant 0 : i32
    %c0_i32_1 = arith.constant 0 : i32
    return %c0_i32, %c0_i32_0 : i32, i32
  }
  func.func @transform_6(%arg0: i32) -> (i32, i32) {
    %c0_i32 = arith.constant 0 : i32
    %c0_i32_0 = arith.constant 0 : i32
    %c0_i32_1 = arith.constant 0 : i32
    return %c0_i32, %c0_i32_0 : i32, i32
  }
  func.func @transform_7(%arg0: i32) -> (i32, i32) {
    %c0_i32 = arith.constant 0 : i32
    %c0_i32_0 = arith.constant 0 : i32
    return %arg0, %c0_i32 : i32, i32
  }
  func.func @transform_8(%arg0: i32) -> (i32, i32) {
    %c0_i32 = arith.constant 0 : i32
    %c0_i32_0 = arith.constant 0 : i32
    return %arg0, %c0_i32 : i32, i32
  }
  func.func @transform_9(%arg0: i32) -> (i32, i32) {
    %c0_i32 = arith.constant 0 : i32
    %c0_i32_0 = arith.constant 0 : i32
    return %arg0, %c0_i32 : i32, i32
  }
}

</mosaic_0001>

<bundles_post_ra>
// kernel: tpu_custom_call.1
= control target key start
LH: loop header
LB: loop body
LE: loop exit
PB: predicated region body
PF: predicated region fallthrough
CT: control target
= control target key end

     0   :  { %s1474_s0 = inlined_call_operand.vmem [shape: f32[16,160], index: 0, kind: input, shape index: {}]   ;;  %s1475_s1 = inlined_call_operand.vmem [shape: f32[160,32], index: 1, kind: input, shape index: {}]   ;;  %s1476_s2 = inlined_call_operand.vmem [shape: f32[32,32], index: 2, kind: input, shape index: {}]   ;;  %s1477_s3 = inlined_call_operand.vmem [shape: f32[32,16], index: 3, kind: input, shape index: {}]   ;;  %s1478_s4 = inlined_call_operand.vmem [shape: f32[16,128], index: 4, kind: input, shape index: {}]   ;;  %s1479_s5 = inlined_call_operand.vmem [shape: f32[6,128], index: 5, kind: input, shape index: {}]   ;;  %s1480_s6 = inlined_call_operand.vmem [shape: f32[1,128], index: 6, kind: input, shape index: {}]   ;;  %s1481_s7 = inlined_call_operand.vmem [shape: s32[16,1], index: 7, kind: input, shape index: {}]   ;;  %s1482_s8 = inlined_call_operand.hbm [shape: f32[16,128], index: 8, kind: output, shape index: {0}]   ;;  %s1483_s9 = inlined_call_operand.hbm [shape: f32[16,128], index: 9, kind: output, shape index: {1}]  }
   0x1   :  { %1486 = sst [smem:[#allocation8_spill]] %s1474_s0 }
   0x2   :  { %15 = vsyncpa [#allocation3], 0 }
   0x3   :  { %17 = vsyncpa [#allocation3 + $0x1], 0 }
   0x4   :  { %18 = vsyncpa [#allocation5], 0 }
   0x5   :  { %20 = vsyncpa [#allocation5 + $0x1], 0  ;;  %s1205_s30 = smov 0   ;;  %s1207_s10 = smov 0  }
   0x6   :  { %s1209_s11 = smov 0   ;;  %s1211_s12 = smov 0  }
   0x7 LB: > { %s1226_s13 = sadd.s32 4294967295, %s1147_s12   ;;  %s891_s14 = sadd.s32 4294967294, %s1147_s12   ;;  %s1147_s12 = sphi %s1211_s12, %s1495_s12   ;;  %s1143_s11 = sphi %s1209_s11, %s1494_s11   ;;  %s1139_s10 = sphi %s1207_s10, %s1493_s10   ;;  %s1135_s30 = sphi %s1205_s30, %s1492_s30  }
   0x8   : > { %s1230_s15 = sadd.s32 1, %s1147_s12   ;;  %s211_s16 = sadd.s32 1, %s1143_s11 }
   0x9   : > { %s208_s17 = ssub.s32 %s1147_s12, %s1230_s15  ;;  %p221_p0 = scmp.ne.s32.totalorder %s1143_s11, %s1139_s10 }
   0xa   : > { %p209_p1 = scmp.eq.s32.totalorder %s208_s17, 0  ;;  %p222_p2 = scmp.eq.s32.totalorder %s1226_s13, 1 }
   0xb   : > { %p227_p3 = scmp.ne.s32.totalorder %s1139_s10, %s1135_s30  ;;  %p228_p4 = scmp.eq.s32.totalorder %s891_s14, 1 }
   0xc   : > { %s1241_s18 = scalar_select %p209_p1, %s1143_s11, %s211_s16  }
   0xd   : > { %p1243_p5 = por %p222_p2, %p221_p0  ;;  %p1247_p6 = por %p228_p4, %p227_p3 }
   0xe   : > { %p894_p7 = scmp.ge.s32.totalorder %s1147_s12, 1  ;;  %p305_p8 = scmp.lt.s32.totalorder %s1147_s12, 3 }
  0x10   : > { %p306_p9 = pnand %p894_p7, %p305_p8 }
  0x11   : > { %v362_v0 = vld [vmem:[%s1475_s1] sm:$0xff] (!%p306_p9)  ;;  %v363_v1 = vld [vmem:[%s1475_s1 + $0x8] sm:$0xff] (!%p306_p9)  ;;  %v364_v2 = vld [vmem:[%s1475_s1 + $0x10] sm:$0xff] (!%p306_p9)  ;;  %p350_p10 = scmp.lt.s32.totalorder (!%p306_p9), %s1226_s13, 1  ;;  %v1149_v3 = vmov (!%p306_p9), 0.0|0.0   ;;  %vm386_vm0 = vcmask (!%p306_p9), 261120   ;;  %v382_v40 = vlaneseq (!%p306_p9) }
  0x12   : > { %309 = sbr.rel (%p306_p9) target bundleno = 1383 (0x567), region = 52  ;;  %954 = vmatprep.subr.bf16.mxu0 (!%p306_p9), %v1149_v3  ;;  %v955_v4 = vpack.c.bf16 (!%p306_p9), %v363_v1, %v362_v0  ;;  %v365_v5 = vld [vmem:[%s1475_s1 + $0x18] sm:$0xff] (!%p306_p9)  ;;  %984 = vmatprep.subr.bf16.mxu1 (!%p306_p9), %v1149_v3  ;;  %v366_v7 = vld [vmem:[%s1475_s1 + $0x20] sm:$0xff] (!%p306_p9)  ;;  %v367_v8 = vld [vmem:[%s1475_s1 + $0x28] sm:$0xff] (!%p306_p9)  ;;  %s1489_s0 = sld [smem:[#allocation8_spill]] (!%p306_p9)  ;;  %vm1150_vm1 = vmmov (!%p306_p9), 0  }
  0x13   : > { %v958_v6 = vpack.c.bf16 (!%p306_p9), %v365_v5, %v364_v2  ;;  %v961_v10 = vpack.c.bf16 (!%p306_p9), %v367_v8, %v366_v7  ;;  %v467_v11 = vld [vmem:[%s1476_s2] sm:$0xff] (!%p306_p9)  ;;  %v468_v12 = vld [vmem:[%s1476_s2 + $0x8] sm:$0xff] (!%p306_p9)  ;;  %v368_v13 = vld [vmem:[%s1475_s1 + $0x30] sm:$0xff] (!%p306_p9)  ;;  %v1151_v39 = vmov (!%p306_p9), 0.0   ;;  %v383_v41 = vshrl.u32 (!%p306_p9), %v382_v40, 7  ;;  %s1381_s23 = sand.u32 (!%p306_p9), 1, %s1139_s10  }
  0x14   : > { %956 = vmatpush1.bf16.msra.mxu0 (!%p306_p9), %v955_v4  ;;  %v369_v14 = vld [vmem:[%s1475_s1 + $0x38] sm:$0xff] (!%p306_p9)  ;;  %v985_v15 = vpack.c.bf16 (!%p306_p9), %v468_v12, %v467_v11  ;;  %v370_v17 = vld [vmem:[%s1475_s1 + $0x40] sm:$0xff] (!%p306_p9)  ;;  %v371_v18 = vld [vmem:[%s1475_s1 + $0x48] sm:$0xff] (!%p306_p9)  ;;  %933 = vmatprep.mubr.msk.f32.mxu1 (!%p306_p9), %vm1150_vm1, %v1151_v39  ;;  %vm652_vm5 = vcmask (!%p306_p9), 130048   ;;  %s1484_s24 = sshll.u32 (!%p306_p9), %s1381_s23, 3  ;;  %s1153_s17 = smov (!%p306_p9), [#allocation2]  }
  0x15   : > { %957 = vmatprep.subr.bf16.mxu0 (!%p306_p9), %v1149_v3  ;;  %v964_v16 = vpack.c.bf16 (!%p306_p9), %v369_v14, %v368_v13  ;;  %v967_v19 = vpack.c.bf16 (!%p306_p9), %v371_v18, %v370_v17  ;;  %v372_v20 = vld [vmem:[%s1475_s1 + $0x50] sm:$0xff] (!%p306_p9)  ;;  %v373_v21 = vld [vmem:[%s1475_s1 + $0x58] sm:$0xff] (!%p306_p9)  ;;  %v374_v23 = vld [vmem:[%s1475_s1 + $0x60] sm:$0xff] (!%p306_p9)  ;;  %v384_v42 = vsub.s32 (!%p306_p9), 0, %v383_v41  ;;  %v463_v44 = vsub.s32 (!%p306_p9), 3, %v383_v41  ;;  %s1389_s28 = scalar_lea.vmem (!%p306_p9), [#allocation2], %s1484_s24 }
  0x16   : > { %986 = vmatpush3.bf16.msra.mxu1 (!%p306_p9), %v985_v15  ;;  %v970_v22 = vpack.c.bf16 (!%p306_p9), %v373_v21, %v372_v20  ;;  %v375_v24 = vld [vmem:[%s1475_s1 + $0x68] sm:$0xff] (!%p306_p9)  ;;  %v376_v26 = vld [vmem:[%s1475_s1 + $0x70] sm:$0xff] (!%p306_p9)  ;;  %v377_v27 = vld [vmem:[%s1475_s1 + $0x78] sm:$0xff] (!%p306_p9)  ;;  %v473_v58 = vsub.s32 (!%p306_p9), 1, %v383_v41  ;;  %v551_v59 = vsub.s32 (!%p306_p9), 4, %v383_v41  ;;  %v639_v7 = vsub.s32 (!%p306_p9), 5, %v383_v41 }
  0x17   : > { %987 = vmatprep.subr.bf16.mxu1 (!%p306_p9), %v1149_v3  ;;  %v973_v25 = vpack.c.bf16 (!%p306_p9), %v375_v24, %v374_v23  ;;  %v976_v28 = vpack.c.bf16 (!%p306_p9), %v377_v27, %v376_v26  ;;  %v378_v29 = vld [vmem:[%s1475_s1 + $0x80] sm:$0xff] (!%p306_p9)  ;;  %v379_v30 = vld [vmem:[%s1475_s1 + $0x88] sm:$0xff] (!%p306_p9)  ;;  %v380_v32 = vld [vmem:[%s1475_s1 + $0x90] sm:$0xff] (!%p306_p9)  ;;  %v1152_v15 = vmov (!%p306_p9), 0   ;;  %v739_v24 = vand.u32 (!%p306_p9), 127, %v382_v40  ;;  %s775_s27 = sshll.u32 (!%p306_p9), %s1389_s28, 4  ;;  %s776_s27 = int_to_ptr.vmem [resolvable:$true] %s775_s27 }
  0x18   : > { %959 = vmatpush1.bf16.msra.mxu0 (!%p306_p9), %v958_v6  ;;  %v979_v31 = vpack.c.bf16 (!%p306_p9), %v379_v30, %v378_v29  ;;  %v381_v33 = vld [vmem:[%s1475_s1 + $0x98] sm:$0xff] (!%p306_p9)  ;;  %v469_v36 = vld [vmem:[%s1476_s2 + $0x10] sm:$0xff] (!%p306_p9)  ;;  %v359_v43 = vld [vmem:[%s1479_s5] sm:$0x3f] (!%p306_p9)  ;;  %v561_v6 = vsub.s32 (!%p306_p9), 2, %v383_v41  ;;  %1047 = vset.pattern.permute.xlu0 (!%p306_p9), %v1152_v15  ;;  %s1053_s16 = scalar_lea.vmem (!%p306_p9), %s776_s27, 128 }
  0x19   : > { %s1269_s29 = scalar_select %p350_p10, %s1226_s13, 1  ;;  %960 = vmatprep.subr.bf16.mxu0 %v1149_v3  ;;  %v982_v34 = vpack.c.bf16 %v381_v33, %v380_v32  ;;  %v470_v37 = vld [vmem:[%s1476_s2 + $0x18] sm:$0xff]  ;;  %v385_v45 = vrot.slane %v359_v43, %v384_v42  ;;  %v464_v46 = vrot.slane %v359_v43, %v463_v44  ;;  %v555_v48 = vld [vmem:[%s1477_s3] sm:$0xff]  ;;  %v556_v49 = vld [vmem:[%s1477_s3 + $0x8] sm:$0xff]  ;;  %v474_v60 = vrot.slane %v359_v43, %v473_v58 }
  0x1a   : > { %v988_v38 = vpack.c.bf16 %v470_v37, %v469_v36  ;;  %v991_v53 = vpack.c.bf16 %v556_v49, %v555_v48  ;;  %v557_v55 = vld [vmem:[%s1477_s3 + $0x10] sm:$0xff]  ;;  %v558_v56 = vld [vmem:[%s1477_s3 + $0x18] sm:$0xff]  ;;  %v552_v61 = vrot.slane %v359_v43, %v551_v59  ;;  %v643_v4 = vld [vmem:[%s1478_s4] sm:$0xff]  ;;  %v562_v8 = vrot.slane %v359_v43, %v561_v6  ;;  %1048 = vset.pattern.permute.xlu1 %v1152_v15  ;;  %p1054_p11 = scmp.ne.s32.totalorder %s776_s27, %s1053_s16 }
  0x1b   : > { %s911_s22 = sshll.u32 %s1269_s29, 4  ;;  %v994_v57 = vpack.c.bf16 %v558_v56, %v557_v55  ;;  %s899_s14 = sshll.u32 %s1269_s29, 3 }
  0x1c   : > { %s1282_s25 = scalar_lea.vmem %s1489_s0, %s911_s22  ;;  %962 = vmatpush1.bf16.msra.mxu0 %v961_v10  ;;  %989 = vmatpush3.bf16.msra.mxu1 %v988_v38  ;;  %s1485_s29 = sshll.u32 %s1226_s13, 7 }
  0x1d   : > { %v361_v9 = vld [vmem:[%s1282_s25 + $0x8] sm:$0xff]  ;;  %963 = vmatprep.subr.bf16.mxu0 %v1149_v3  ;;  %v360_v35 = vld [vmem:[%s1282_s25] sm:$0xff]  ;;  %990 = vmatprep.subr.bf16.mxu1 %v1149_v3  ;;  %s358_s25 = scalar_lea.vmem %s1481_s7, %s899_s14  ;;  %s1403_s26 = scalar_lea.hbm %s1482_s8, %s1485_s29 }
  0x1e   : > { %900 = vmatprep.mubr.msk.f32.mxu0 %vm386_vm0, %v361_v9  ;;  %v640_v9 = vrot.slane %v359_v43, %v639_v7  ;;  %v737_v20 = vld [vmem:[%s358_s25] sm:$0xff]  ;;  %s757_s14 = scalar_lea.sflag [#allocation3], %s1381_s23  ;;  %p1055_p12 = pnand %p1054_p11, %p1243_p5 }
  0x1f   : > { %vm747_vm7 = vcmp.ne.s32.totalorder %v737_v20, 0  ;;  %s1057_s25 = sshll.u32 %s1153_s17, 4  ;;  %s1058_s25 = int_to_ptr.vmem [resolvable:$false] %s1057_s25 }
  0x20   : > { %965 = vmatpush1.bf16.msra.mxu0 %v964_v16  ;;  %v903_v16 = vld [vmem:[%s1480_s6] ss:$0 sm:$0xff]  ;;  %p1056_p13 = pneg %p1055_p12  ;;  %s1059_s24 = scalar_lea.vmem %s1058_s25, 256 }
  0x21   : > { %966 = vmatprep.subr.bf16.mxu0 %v1149_v3  ;;  %p1060_p0 = scmp.lt.s32.totalorder %s776_s27, %s1058_s25  ;;  %p1061_p1 = scmp.lt.s32.totalorder %s1059_s24, %s1053_s16 }
  0x23   : > { %p1062_p2 = por %p1061_p1, %p1060_p0 }
  0x24   : > { %968 = vmatpush1.bf16.msra.mxu0 %v967_v19 }
  0x25   : > { %969 = vmatprep.subr.bf16.mxu0 %v1149_v3  ;;  %p1063_p3 = pnand %p1062_p2, %p1056_p13 }
  0x28   : > { %971 = vmatpush1.bf16.msra.mxu0 %v970_v22 }
  0x29   : > { %972 = vmatprep.subr.bf16.mxu0 %v1149_v3 }
  0x2c   : > { %974 = vmatpush1.bf16.msra.mxu0 %v973_v25 }
  0x2d   : > { %975 = vmatprep.subr.bf16.mxu0 %v1149_v3 }
  0x30   : > { %977 = vmatpush1.bf16.msra.mxu0 %v976_v28 }
  0x31   : > { %978 = vmatprep.subr.bf16.mxu0 %v1149_v3 }
  0x34   : > { %980 = vmatpush1.bf16.msra.mxu0 %v979_v31 }
  0x35   : > { %981 = vmatprep.subr.bf16.mxu0 %v1149_v3 }
  0x38   : > { %983 = vmatpush1.bf16.msra.mxu0 %v982_v34 }
  0x3b   : > { %455 = vmatmul.mubr.f32.vlgmr.msra.gmra.mrb[0].mxu0 %v360_v35 }
 0x10e   : > { %v456_v47 = vpop.f32.mrb[0].mxu0 }
 0x10f   : > { %v457_v50 = vadd.f32 %v456_v47, %v385_v45  ;;  %v458_v51 = vpop.f32.mrb[1].mxu0 }
 0x111   : > { %vm460_vm2 = vcmp.gt.f32.partialorder %v457_v50, 0.0  ;;  %v465_v52 = vmul.f32 %v464_v46, %v457_v50 }
 0x113   : > { %v466_v54 = vsel %vm460_vm2, %v457_v50, %v465_v52 }
 0x114   : > { %934 = vmatmul.mubr.msk.f32.vlgmr.msra.gmra.mrb[0].mxu1 %vm386_vm0, %v466_v54 }
 0x115   : > { %992 = vmatpush3.bf16.msra.mxu1 %v991_v53  ;;  %944 = vmatprep.mubr.msk.f32.mxu1 %vm1150_vm1, %v1151_v39 }
 0x116   : > { %993 = vmatprep.subr.bf16.mxu1 %v1149_v3 }
 0x119   : > { %995 = vmatpush3.bf16.msra.mxu1 %v994_v57 }
 0x11a   : > { %996 = vmatprep.subr.bf16.mxu1 %v1149_v3  ;;  %v644_v3 = vld [vmem:[%s1478_s4 + $0x8] sm:$0xff] }
 0x11b   : > { %v997_v5 = vpack.c.bf16 %v644_v3, %v643_v4 }
 0x1e7   : > { %v544_v62 = vpop.f32.mrb[0].mxu1 }
 0x1e8   : > { %v545_v63 = vadd.f32 %v544_v62, %v474_v60  ;;  %v935_v0 = vpop.f32.mrb[1].mxu1 }
 0x1ea   : > { %vm548_vm3 = vcmp.gt.f32.partialorder %v545_v63, 0.0  ;;  %v553_v1 = vmul.f32 %v552_v61, %v545_v63 }
 0x1ec   : > { %v554_v2 = vsel %vm548_vm3, %v545_v63, %v553_v1 }
 0x1ed   : > { %945 = vmatmul.mubr.msk.f32.vlgmr.msra.gmra.mrb[2].mxu1 %vm386_vm0, %v554_v2 }
 0x1ee   : > { %951 = vmatprep.mubr.msk.f32.mxu1 %vm1150_vm1, %v1151_v39  ;;  %998 = vmatpush3.bf16.msra.mxu1 %v997_v5 }
 0x2c0   : > { %v632_v10 = vpop.f32.mrb[2].mxu1 }
 0x2c1   : > { %v633_v11 = vadd.f32 %v632_v10, %v562_v8  ;;  %v946_v12 = vpop.f32.mrb[3].mxu1 }
 0x2c3   : > { %vm636_vm4 = vcmp.gt.f32.partialorder %v633_v11, 0.0  ;;  %v641_v13 = vmul.f32 %v640_v9, %v633_v11 }
 0x2c5   : > { %v642_v14 = vsel %vm636_vm4, %v633_v11, %v641_v13 }
 0x2c6   : > { %952 = vmatmul.mubr.msk.f32.vlgmr.msra.gmra.mrb[4].mxu1 %vm652_vm5, %v642_v14 }
 0x399   : > { %v722_v17 = vpop.f32.mrb[4].mxu1 }
 0x39a   : > { %v723_v18 = vadd.f32 %v903_v16, %v722_v17  ;;  %v953_v19 = vpop.f32.mrb[5].mxu1 }
 0x39c   : > { %727 = vmax.xlane.f32.xlu0 %v723_v18  ;;  %726 = vst [vmem:[%s1389_s28] sm:$0xff] %v723_v18 }
 0x3b2   : > { %741 = vperm.xlu0 %1047, %v737_v20  }
 0x429   : > { %v728_v21 = vpop.xlane.xlu0 %727 }
 0x42a   : > { %v729_v22 = vsub.f32 %v723_v18, %v728_v21 }
 0x42c   : > { %v730_v23 = vmul.f32 1.442695, %v729_v22 }
 0x42e   : > { %1049 = vpow2.f32 %v730_v23 }
 0x431   : > { %v742_v25 = vpop.permute.xlu0 %741 }
 0x432   : > { %vm743_vm6 = vcmp.eq.s32.totalorder %v739_v24, %v742_v25 }
 0x433   : > { %v744_v27 = vsel %vm743_vm6, %v723_v18, 0.0 }
 0x438   : > { %v1050_v26 = vpop.eup %1049 }
 0x439   : > { %732 = vadd.xlane.f32.xlu1 %v1050_v26 }
 0x43d   : > { %745 = vadd.xlane.f32.xlu1 %v744_v27 }
 0x4c6   : > { %v733_v28 = vpop.xlane.xlu1 %732 }
 0x4c7   : > { %1051 = vlog2.f32 %v733_v28 }
 0x4ca   : > { %v746_v32 = vpop.xlane.xlu1 %745 }
 0x4d1   : > { %v1052_v29 = vpop.eup %1051 }
 0x4d2   : > { %v735_v30 = vmul.f32 0.6931472, %v1052_v29 }
 0x4d4   : > { %v736_v31 = vadd.f32 %v735_v30, %v728_v21 }
 0x4d6   : > { %v748_v33 = vsub.f32 %v736_v31, %v746_v32 }
 0x4d8   : > { %v749_v34 = vsel %vm747_vm7, %v748_v33, 0.0 }
 0x4d9   : > { %752 = vperm.xlu1 %1048, %v749_v34  }
 0x4da   : > { %1066 = shalt.err (!%p1063_p3)
}
 0x4db   : > { %s1067_s28 = scalar_lea.hbm %s1403_s26, 128  ;;  %s1071_s17 = scalar_lea.hbm %s1482_s8, 256 }
 0x4dc   : > { %p1068_p4 = scmp.ne.s32.totalorder %s1403_s26, %s1067_s28  ;;  %p1072_p9 = scmp.lt.u32.totalorder %s1403_s26, %s1482_s8 }
 0x4dd   : > { %p1073_p10 = scmp.lt.u32.totalorder %s1071_s17, %s1067_s28  ;;  %p1075_p12 = scmp.lt.u32.totalorder %s1067_s28, %s1403_s26 }
 0x4de   : > { %p1069_p7 = pnand %p1068_p4, %p1243_p5 }
 0x4df   : > { %p1074_p11 = por %p1073_p10, %p1072_p9 }
 0x4e0   : > { %p1070_p8 = pneg %p1069_p7 }
 0x4e1   : > { %p1076_p13 = por %p1075_p12, %p1074_p11 }
 0x4e3   : > { %p1077_p0 = pnand %p1076_p13, %p1070_p8 }
 0x4e5   : > { %1080 = shalt.err (!%p1077_p0)
}
 0x4e6   : > { %999 = dma.vmem_to_hbm [thread:$0]  (%p1243_p5), %s776_s27, 128, %s1403_s26, %s757_s14  }
 0x4e7   : > { %s1490_s24 = sshll.u32 %s1381_s23, 3  ;;  %s1491_s29 = sshll.u32 %s1226_s13, 7 }
 0x4e8   : > { %s349_s16 = scalar_lea.vmem [#allocation4], %s1490_s24  ;;  %s1433_s28 = scalar_lea.hbm %s1483_s9, %s1491_s29 }
 0x4e9   : > { %s788_s21 = sshll.u32 %s349_s16, 4  ;;  %s762_s25 = scalar_lea.sflag [#allocation5], %s1381_s23  ;;  %s1426_s21 = int_to_ptr.vmem [resolvable:$true] %s788_s21 }
 0x4ea   : > { %s1081_s0 = scalar_lea.vmem %s1426_s21, 128  ;;  %s1154_s26 = smov [#allocation4]  }
 0x4eb   : > { %p1082_p1 = scmp.ne.s32.totalorder %s1426_s21, %s1081_s0  ;;  %s1085_s27 = sshll.u32 %s1154_s26, 4  ;;  %s1086_s27 = int_to_ptr.vmem [resolvable:$false] %s1085_s27 }
 0x4ec   : > { %s1087_s13 = scalar_lea.vmem %s1086_s27, 256  ;;  %p1088_p4 = scmp.lt.s32.totalorder %s1426_s21, %s1086_s27 }
 0x4ed   : > { %p1083_p2 = pnand %p1082_p1, %p1243_p5  ;;  %p1089_p7 = scmp.lt.s32.totalorder %s1087_s13, %s1081_s0 }
 0x4ef   : > { %p1084_p3 = pneg %p1083_p2  ;;  %p1090_p8 = por %p1089_p7, %p1088_p4 }
 0x4f1   : > { %p1091_p9 = pnand %p1090_p8, %p1084_p3 }
 0x558   : > { %v753_v35 = vpop.permute.xlu1 %752 }
 0x559   : > { %755 = vst [vmem:[%s349_s16] sm:$0xff] %v753_v35 }
 0x55a   : > { %1094 = shalt.err (!%p1091_p9)
}
 0x55b   : > { %s1095_s23 = scalar_lea.hbm %s1433_s28, 128  ;;  %s1099_s16 = scalar_lea.hbm %s1483_s9, 256 }
 0x55c   : > { %p1096_p10 = scmp.ne.s32.totalorder %s1433_s28, %s1095_s23  ;;  %p1100_p13 = scmp.lt.u32.totalorder %s1433_s28, %s1483_s9 }
 0x55d   : > { %p1101_p0 = scmp.lt.u32.totalorder %s1099_s16, %s1095_s23  ;;  %p1103_p2 = scmp.lt.u32.totalorder %s1095_s23, %s1433_s28 }
 0x55e   : > { %p1097_p11 = pnand %p1096_p10, %p1243_p5 }
 0x55f   : > { %p1102_p1 = por %p1101_p0, %p1100_p13 }
 0x560   : > { %p1098_p12 = pneg %p1097_p11 }
 0x561   : > { %p1104_p3 = por %p1103_p2, %p1102_p1 }
 0x563   : > { %p1105_p4 = pnand %p1104_p3, %p1098_p12 }
 0x565   : > { %1108 = shalt.err (!%p1105_p4)
}
 0x566   : > { %1000 = dma.vmem_to_hbm [thread:$0]  (%p1243_p5), %s1426_s21, 128, %s1433_s28, %s762_s25  }
 0x567 PF: > { %p1010_p7 = scmp.ge.s32.totalorder %s1147_s12, 2  ;;  %s800_s0 = sand.u32 1, %s1135_s30  }
 0x568   : > { %s801_s17 = scalar_lea.sflag [#allocation3], %s800_s0 }
 0x569   : > { %p1004_p8 = pnand %p1010_p7, %p1247_p6 }
 0x56b   : > { %1126 = dma.done.wait (!%p1004_p8), %s801_s17, 128  }
 0x56c   : > { %1128 = vsyncadd (!%p1004_p8), %s801_s17, 4294967168  ;;  %s810_s26 = scalar_lea.sflag [#allocation5], %s800_s0 }
 0x56d   : > { %1130 = dma.done.wait (!%p1004_p8), %s810_s26, 128  }
 0x56e   : > { %1132 = vsyncadd (!%p1004_p8), %s810_s26, 4294967168  ;;  %p23_p5 = scmp.ge.s32.totalorder %s1230_s15, 4   ;;  %s1492_s30 = smov %s1139_s10 }
 0x56f   : > { %s1493_s10 = smov %s1143_s11  ;;  %s1494_s11 = smov %s1241_s18 }
 0x570   : > { %s1495_s12 = smov %s1230_s15  ;;  %25 = sbr.rel (!%p23_p5) target bundleno = 7 (0x7), region = 107 }
 0x577   :  { %815 = vsyncpa [#allocation3], 1 }
 0x578   :  { %817 = vsyncpa [#allocation3 + $0x1], 1 }
 0x579   :  { %818 = vsyncpa [#allocation5], 1 }
 0x57a   :  { %820 = vsyncpa [#allocation5 + $0x1], 1 }

</bundles_post_ra>
